<compile_context>
chip_gen: v6e
topology: v6e:2x2x1
jax: 0.10.0
libtpu: 0.0.40
codegen_flags: <defaults>
</compile_context>

<pallas_src>
import functools

import jax
import jax.numpy as jnp
from jax import lax
from jax.experimental import pallas as pl
from jax.experimental.pallas import tpu as pltpu


def _int_pow(x, p):
    """x**p via repeated multiplies when p is a small non-negative integer."""
    pf = float(p)
    if pf.is_integer() and 0 <= pf <= 16:
        n = int(pf)
        if n == 0:
            return jnp.ones_like(x)
        result = None
        base = x
        while n:
            if n & 1:
                result = base if result is None else result * base
            n >>= 1
            if n:
                base = base * base
        return result
    return jnp.power(x, pf)


def _lane_fold(x, out_cols):
    """Fold (g, tile_cols) -> (g, out_cols) with vreg-aligned static slices.

    out_cols is either 128 (tile_cols a multiple of 128) or tile_cols itself;
    slices land exactly on 128-lane vreg boundaries so this is pure VPU adds.
    """
    tile_cols = x.shape[-1]
    if tile_cols == out_cols:
        return x
    acc = x[:, 0:out_cols]
    for c in range(1, tile_cols // out_cols):
        acc = acc + x[:, c * out_cols:(c + 1) * out_cols]
    return acc


def _focal_kernel(*refs, alpha, beta, rows, tile_rows, group, out_cols,
                  has_row_w, has_pix_w):
    """Per-(row-tile, lane-tile) focal-loss partial sums.

    Each grid step writes a lane-dense (group, out_cols) f32 partial of the
    summed (pos + neg) focal-loss terms and of the weighted positive count.
    """
    idx = 0
    pred_ref = refs[idx]; idx += 1
    tgt_ref = refs[idx]; idx += 1
    row_ref = None
    pix_ref = None
    if has_row_w:
        row_ref = refs[idx]; idx += 1
    if has_pix_w:
        pix_ref = refs[idx]; idx += 1
    loss_ref, npos_ref = refs[idx], refs[idx + 1]

    n_groups = tile_rows // group
    ragged = (rows % tile_rows) != 0
    tile_row0 = pl.program_id(0) * tile_rows  # first global row of this tile

    def group_partial(r0):
        pred = pred_ref[pl.ds(r0, group), :].astype(jnp.float32)
        tgt = tgt_ref[pl.ds(r0, group), :].astype(jnp.float32)

        one_m_pred = 1.0 - pred
        one_m_tgt = 1.0 - tgt
        pos_sel = tgt == 1.0
        neg_sel = tgt < 1.0

        # pos_core = log(p)   * (1-p)^alpha              (at target == 1)
        # neg_core = log(1-p) * p^alpha   * (1-t)^beta   (at target <  1)
        pos_core = jnp.log(pred) * _int_pow(one_m_pred, alpha)
        neg_core = (jnp.log(one_m_pred) * _int_pow(pred, alpha)
                    * _int_pow(one_m_tgt, beta))

        # Single nested select instead of two where + add (VPU trim).
        base = jnp.where(pos_sel, pos_core, jnp.where(neg_sel, neg_core, 0.0))
        cnt = pos_sel.astype(jnp.float32)

        w = None
        if has_row_w:
            w = row_ref[pl.ds(r0, group), :].astype(jnp.float32)      # (group, 1)
        if has_pix_w:
            pw = pix_ref[pl.ds(r0, group), :].astype(jnp.float32)     # (group, cols)
            w = pw if w is None else w * pw
        if w is not None:
            base = base * w
            cnt = cnt * w

        if ragged:
            # Select (not multiply): garbage rows of the padded last tile can
            # hold values whose log() is NaN/Inf, and NaN * 0 == NaN.
            gidx = (tile_row0 + r0
                    + lax.broadcasted_iota(jnp.int32, (group, 1), 0))
            valid = gidx < rows
            base = jnp.where(valid, base, 0.0)
            cnt = jnp.where(valid, cnt, 0.0)

        return _lane_fold(base, out_cols), _lane_fold(cnt, out_cols)

    if n_groups == 1:
        loss_acc, cnt_acc = group_partial(0)
    else:
        def body(g, carry):
            la, ca = carry
            r0 = pl.multiple_of(g * group, group)
            lp, cp = group_partial(r0)
            return la + lp, ca + cp

        init = (jnp.zeros((group, out_cols), jnp.float32),
                jnp.zeros((group, out_cols), jnp.float32))
        unroll = True if n_groups <= 8 else 8
        loss_acc, cnt_acc = lax.fori_loop(0, n_groups, body, init,
                                          unroll=unroll)

    loss_ref[...] = loss_acc
    npos_ref[...] = cnt_acc


def _build_weights(target, target_weights, mask, skip_empty_channel):
    """Mirror of KeypointMSELoss._get_mask, split into a keypoint-wise (B, K)
    f32 weight and a pixel-wise (B, K, H, W) weight kept in a narrow dtype.
    The two are combined *inside* the kernel (no f32 pre-multiply pass)."""
    row = None   # (B, K) f32
    pix = None   # (B, K, H, W), narrow dtype
    if mask is not None:
        assert mask.ndim == target.ndim and all(
            dm == dt or dm == 1 for dm, dt in zip(mask.shape, target.shape)), (
                f"mask/target shape mismatch {mask.shape} vs {target.shape}")
        pix = mask
    if target_weights is not None:
        assert target_weights.ndim in (2, 4), target_weights.shape
        assert target_weights.shape == target.shape[:target_weights.ndim], (
            f"target_weights/target shape mismatch "
            f"{target_weights.shape} vs {target.shape}")
        if target_weights.ndim == 2:
            row = target_weights.astype(jnp.float32)
        elif pix is None:
            pix = target_weights
        else:
            # TODO(synk): rare "mask AND pixel-wise target_weights" case pays one
            # extra fused elementwise pass here.
            pix = pix.astype(jnp.float32) * target_weights.astype(jnp.float32)
    if skip_empty_channel:
        # TODO(synk): upstream PyTorch calls `.any()` with no dim (collapses to a
        # scalar, likely a bug); we implement the documented per-channel intent.
        ch = jnp.any(target != 0, axis=(2, 3)).astype(jnp.float32)
        row = ch if row is None else row * ch
    if pix is not None:
        if jnp.issubdtype(pix.dtype, jnp.bool_) or jnp.issubdtype(pix.dtype, jnp.integer):
            # Keep the extra stream as narrow as the heatmaps (float dtype for
            # clean Pallas refs) instead of materializing an f32 copy.
            pix = pix.astype(target.dtype)
        if pix.shape != target.shape:
            # TODO(synk): (B, 1, H, W) masks are duplicated K-fold on the wire; a
            # K-aware index_map could stream the un-broadcast mask instead.
            pix = jnp.broadcast_to(pix, target.shape)
    return row, pix


def _pick_col_tile(cols, target=2048):
    """Largest multiple of 128 that divides cols and is <= target (or cols)."""
    if cols % 128 != 0 or cols <= target:
        return cols
    best = 128
    t = 128
    while t <= target:
        if cols % t == 0:
            best = t
        t += 128
    return best


def focal_heatmap_loss(output, target, target_weights=None, mask=None, *,
                       alpha=2, beta=4, use_target_weight=False,
                       skip_empty_channel=False, loss_weight=1.0):
    """Matches FocalHeatmapLoss.forward. output/target: (B, K, H, W).

    Inputs may be bf16 (recommended on v5e/v6e) — they are streamed in their
    native dtype and upcast in-kernel; do NOT pre-cast to f32.
    """
    assert output.shape == target.shape and output.ndim == 4
    # Like the upstream forward (which never checks use_target_weight either),
    # weights are applied whenever `target_weights` is provided.
    del use_target_weight
    B, K, H, W = output.shape
    rows, cols = B * K, H * W

    row_w, pix_w = _build_weights(target, target_weights, mask,
                                  skip_empty_channel)

    pred2 = output.reshape(rows, cols)   # native dtype on the wire
    tgt2 = target.reshape(rows, cols)

    # ---------- column (lane) tiling ----------
    tile_cols = _pick_col_tile(cols)
    grid_cols = cols // tile_cols
    out_cols = 128 if tile_cols % 128 == 0 else tile_cols

    # ---------- dtype-aware sublane granularity ----------
    streamed_dtypes = [pred2.dtype, tgt2.dtype]
    if pix_w is not None:
        streamed_dtypes.append(pix_w.dtype)
    sub_mult = 8
    for dt in streamed_dtypes:
        isz = jnp.dtype(dt).itemsize
        if isz < 4:
            sub_mult = max(sub_mult, 8 * (4 // isz))

    # ---------- generation-aware VMEM budget ----------
    try:
        info = pltpu.get_tpu_info()
        vmem_cap = int(getattr(info, "vmem_capacity_bytes", 64 * 1024 * 1024))
    except Exception:  # not on TPU / info unavailable -> conservative default
        vmem_cap = 64 * 1024 * 1024
    # 128 MiB VMEM (v5e/v6e) -> 64 MiB scoped limit; 64 MiB (v7x) -> 32 MiB.
    vmem_limit = max(32 * 1024 * 1024, min(vmem_cap // 2, 64 * 1024 * 1024))
    # Headroom for output double-buffers, (group, tile_cols) f32 working set
    # and compiler-internal scratch.
    headroom = 4 * 1024 * 1024
    input_budget = int((vmem_limit - headroom) * 0.75)

    bytes_per_row = tile_cols * (jnp.dtype(pred2.dtype).itemsize
                                 + jnp.dtype(tgt2.dtype).itemsize)
    if pix_w is not None:
        bytes_per_row += tile_cols * jnp.dtype(pix_w.dtype).itemsize
    if row_w is not None:
        bytes_per_row += 4
    bytes_per_row *= 2  # double-buffered streamed inputs
    max_tile_rows = max(sub_mult,
                        min(512, input_budget // max(1, bytes_per_row)))

    # ---------- row tiling: budget cap + keep >= ~8 grid steps ----------
    if rows < sub_mult:
        tile_rows = rows          # full row extent (exempt from divisibility)
        group = rows
    else:
        target_steps = 8
        want_row_steps = max(1, -(-target_steps // grid_cols))
        per_step = -(-rows // want_row_steps)
        step_cap = -(-per_step // sub_mult) * sub_mult
        rows_floor = (rows // sub_mult) * sub_mult
        budget_rows = max(sub_mult, (max_tile_rows // sub_mult) * sub_mult)
        tile_rows = max(sub_mult, min(budget_rows, step_cap, rows_floor))
        group = sub_mult
    grid_rows = -(-rows // tile_rows)
    out_rows = group

    # ---------- specs ----------
    in_arrays = [pred2, tgt2]
    in_specs = [pl.BlockSpec((tile_rows, tile_cols), lambda i, j: (i, j)),
                pl.BlockSpec((tile_rows, tile_cols), lambda i, j: (i, j))]
    if row_w is not None:
        in_arrays.append(row_w.reshape(rows, 1))
        in_specs.append(pl.BlockSpec((tile_rows, 1), lambda i, j: (i, 0)))
    if pix_w is not None:
        in_arrays.append(pix_w.reshape(rows, cols))
        in_specs.append(pl.BlockSpec((tile_rows, tile_cols),
                                     lambda i, j: (i, j)))

    kernel = functools.partial(
        _focal_kernel, alpha=alpha, beta=beta, rows=rows,
        tile_rows=tile_rows, group=group, out_cols=out_cols,
        has_row_w=row_w is not None, has_pix_w=pix_w is not None)

    out_shape = (
        jax.ShapeDtypeStruct((grid_rows * out_rows, grid_cols * out_cols),
                             jnp.float32),
        jax.ShapeDtypeStruct((grid_rows * out_rows, grid_cols * out_cols),
                             jnp.float32))
    out_specs = [pl.BlockSpec((out_rows, out_cols), lambda i, j: (i, j)),
                 pl.BlockSpec((out_rows, out_cols), lambda i, j: (i, j))]

    loss_part, npos_part = pl.pallas_call(
        kernel,
        out_shape=out_shape,
        grid_spec=pltpu.PrefetchScalarGridSpec(
            num_scalar_prefetch=0,
            grid=(grid_rows, grid_cols),
            in_specs=in_specs,
            out_specs=out_specs),
        compiler_params=pltpu.CompilerParams(
            dimension_semantics=("parallel", "parallel"),
            vmem_limit_bytes=int(vmem_limit)),
    )(*in_arrays)

    # Tiny final reduction + the num_pos branch, as scalar JAX glue.
    loss_sum = jnp.sum(loss_part, dtype=jnp.float32)
    num_pos = jnp.sum(npos_part, dtype=jnp.float32)
    denom = jnp.where(num_pos > 0, num_pos, jnp.float32(1.0))
    loss = jnp.where(num_pos > 0, -loss_sum / denom, -loss_sum)
    return loss * jnp.float32(loss_weight)


def _focal_heatmap_loss_ref(output, target, target_weights=None, mask=None, *,
                            alpha=2, beta=4, skip_empty_channel=False,
                            loss_weight=1.0):
    """Pure-JAX mirror of the PyTorch FocalHeatmapLoss.forward."""
    output = output.astype(jnp.float32)
    target = target.astype(jnp.float32)
    _mask = None
    if mask is not None:
        _mask = jnp.broadcast_to(mask.astype(jnp.float32), target.shape)
    if target_weights is not None:
        ndim_pad = target.ndim - target_weights.ndim
        tw = target_weights.reshape(
            target_weights.shape + (1,) * ndim_pad).astype(jnp.float32)
        _mask = tw if _mask is None else _mask * tw
    if skip_empty_channel:
        ch = jnp.any(target != 0, axis=(2, 3)).astype(jnp.float32)[:, :, None, None]
        _mask = ch if _mask is None else _mask * ch

    pos_inds = (target == 1).astype(jnp.float32)
    neg_inds = (target < 1).astype(jnp.float32)
    if _mask is not None:
        pos_inds = pos_inds * _mask
        neg_inds = neg_inds * _mask
    neg_weights = jnp.power(1.0 - target, beta)
    pos_loss = jnp.log(output) * jnp.power(1.0 - output, alpha) * pos_inds
    neg_loss = jnp.log(1.0 - output) * jnp.power(output, alpha) * neg_weights * neg_inds
    num_pos = jnp.sum(pos_inds)
    denom = jnp.where(num_pos == 0, 1.0, num_pos)
    loss = jnp.where(num_pos == 0,
                     -jnp.sum(neg_loss),
                     -(jnp.sum(pos_loss) + jnp.sum(neg_loss)) / denom)
    return loss * loss_weight


if __name__ == "__main__":
    key = jax.random.PRNGKey(0)
    k1, k2, k3, k4 = jax.random.split(key, 4)
    B, K, H, W = 2, 4, 16, 16

    output = jax.random.uniform(k1, (B, K, H, W), jnp.float32,
                                minval=0.05, maxval=0.95)
    target = jax.random.uniform(k2, (B, K, H, W), jnp.float32,
                                minval=0.0, maxval=0.9)
    # One exact positive (target == 1) per channel, like a keypoint heatmap peak.
    target = target.at[:, :, H // 2, W // 2].set(1.0)

    # 1) Unweighted path.
    loss = focal_heatmap_loss(output, target, alpha=2, beta=4, loss_weight=1.0)
    loss = jax.block_until_ready(loss)
    ref = _focal_heatmap_loss_ref(output, target, alpha=2, beta=4,
                                  loss_weight=1.0)
    assert jnp.allclose(loss, ref, rtol=1e-4, atol=1e-5), (loss, ref)

    # 2) Keypoint-wise target_weights path (fused in-kernel as a (tile_rows,1) block).
    tw = 0.5 + jax.random.uniform(k3, (B, K), jnp.float32)
    loss_w = focal_heatmap_loss(output, target, target_weights=tw,
                                alpha=2, beta=4, use_target_weight=True,
                                loss_weight=1.0)
    loss_w = jax.block_until_ready(loss_w)
    ref_w = _focal_heatmap_loss_ref(output, target, target_weights=tw,
                                    alpha=2, beta=4, loss_weight=1.0)
    assert jnp.allclose(loss_w, ref_w, rtol=1e-4, atol=1e-5), (loss_w, ref_w)

    # 3) bf16 heatmaps + pixel-wise (B,1,H,W) bool mask + keypoint weights
    #    (narrow-dtype wire, in-kernel mask multiply).
    out_bf = output.astype(jnp.bfloat16)
    tgt_bf = target.astype(jnp.bfloat16)
    pix_mask = jax.random.uniform(k4, (B, 1, H, W), jnp.float32) > 0.3
    loss_m = focal_heatmap_loss(out_bf, tgt_bf, target_weights=tw,
                                mask=pix_mask, alpha=2, beta=4,
                                use_target_weight=True, loss_weight=0.5)
    loss_m = jax.block_until_ready(loss_m)
    ref_m = _focal_heatmap_loss_ref(out_bf, tgt_bf, target_weights=tw,
                                    mask=pix_mask, alpha=2, beta=4,
                                    loss_weight=0.5)
    assert jnp.allclose(loss_m, ref_m, rtol=2e-4, atol=1e-5), (loss_m, ref_m)

    # 4) skip_empty_channel (per-channel intent; see TODO about upstream .any()).
    tgt_empty = target.at[0, 1].set(0.0)
    loss_s = focal_heatmap_loss(output, tgt_empty, alpha=2, beta=4,
                                skip_empty_channel=True, loss_weight=1.0)
    loss_s = jax.block_until_ready(loss_s)
    ref_s = _focal_heatmap_loss_ref(output, tgt_empty, alpha=2, beta=4,
                                    skip_empty_channel=True, loss_weight=1.0)
    assert jnp.allclose(loss_s, ref_s, rtol=1e-4, atol=1e-5), (loss_s, ref_s)

    print("KERNEL_OK")
</pallas_src>

<mosaic_0001>
module attributes {stable_mosaic.version = 11 : i64} {
  func.func @_focal_kernel(%arg0: i32, %arg1: i32, %arg2: memref<8x256xf32, #tpu.memory_space<vmem>>, %arg3: memref<8x256xf32, #tpu.memory_space<vmem>>, %arg4: memref<8x128xf32, #tpu.memory_space<vmem>>, %arg5: memref<8x128xf32, #tpu.memory_space<vmem>>) attributes {dimension_semantics = [#tpu.dimension_semantics<parallel>, #tpu.dimension_semantics<parallel>], iteration_bounds = array<i64: 1, 1>, scalar_prefetch = 0 : i64, scratch_operands = 0 : i64, tpu.core_type = #tpu.core_type<tc>, window_params = [{transform_indices = @transform_0, window_bounds = array<i64: 8, 256>}, {transform_indices = @transform_1, window_bounds = array<i64: 8, 256>}, {transform_indices = @transform_2, window_bounds = array<i64: 8, 128>}, {transform_indices = @transform_3, window_bounds = array<i64: 8, 128>}]} {
    %c0 = arith.constant 0 : index
    %c0_0 = arith.constant 0 : index
    %0 = vector.load %arg2[%c0, %c0_0] : memref<8x256xf32, #tpu.memory_space<vmem>>, vector<8x256xf32>
    %c0_1 = arith.constant 0 : index
    %c0_2 = arith.constant 0 : index
    %1 = vector.load %arg3[%c0_1, %c0_2] : memref<8x256xf32, #tpu.memory_space<vmem>>, vector<8x256xf32>
    %cst = arith.constant 1.000000e+00 : f32
    %2 = vector.broadcast %cst : f32 to vector<8x256xf32>
    %3 = arith.subf %2, %0 : vector<8x256xf32>
    %cst_3 = arith.constant 1.000000e+00 : f32
    %4 = vector.broadcast %cst_3 : f32 to vector<8x256xf32>
    %5 = arith.subf %4, %1 : vector<8x256xf32>
    %cst_4 = arith.constant 1.000000e+00 : f32
    %6 = vector.broadcast %cst_4 : f32 to vector<8x256xf32>
    %7 = arith.cmpf oeq, %1, %6 : vector<8x256xf32>
    %cst_5 = arith.constant 1.000000e+00 : f32
    %8 = vector.broadcast %cst_5 : f32 to vector<8x256xf32>
    %9 = arith.cmpf olt, %1, %8 : vector<8x256xf32>
    %10 = math.log %0 : vector<8x256xf32>
    %11 = arith.mulf %3, %3 : vector<8x256xf32>
    %12 = arith.mulf %10, %11 : vector<8x256xf32>
    %13 = math.log %3 : vector<8x256xf32>
    %14 = arith.mulf %0, %0 : vector<8x256xf32>
    %15 = arith.mulf %13, %14 : vector<8x256xf32>
    %16 = arith.mulf %5, %5 : vector<8x256xf32>
    %17 = arith.mulf %16, %16 : vector<8x256xf32>
    %18 = arith.mulf %15, %17 : vector<8x256xf32>
    %cst_6 = arith.constant 0.000000e+00 : f32
    %19 = vector.broadcast %cst_6 : f32 to vector<8x256xf32>
    %20 = arith.select %9, %18, %19 : vector<8x256xi1>, vector<8x256xf32>
    %21 = arith.select %7, %12, %20 : vector<8x256xi1>, vector<8x256xf32>
    %22 = arith.extui %7 : vector<8x256xi1> to vector<8x256xi32>
    %23 = arith.sitofp %22 : vector<8x256xi32> to vector<8x256xf32>
    %24 = vector.extract_strided_slice %21 {offsets = [0, 0], sizes = [8, 128], strides = [1, 1]} : vector<8x256xf32> to vector<8x128xf32>
    %25 = vector.extract_strided_slice %21 {offsets = [0, 128], sizes = [8, 128], strides = [1, 1]} : vector<8x256xf32> to vector<8x128xf32>
    %26 = arith.addf %24, %25 : vector<8x128xf32>
    %27 = vector.extract_strided_slice %23 {offsets = [0, 0], sizes = [8, 128], strides = [1, 1]} : vector<8x256xf32> to vector<8x128xf32>
    %28 = vector.extract_strided_slice %23 {offsets = [0, 128], sizes = [8, 128], strides = [1, 1]} : vector<8x256xf32> to vector<8x128xf32>
    %29 = arith.addf %27, %28 : vector<8x128xf32>
    %c0_7 = arith.constant 0 : index
    %c0_8 = arith.constant 0 : index
    %30 = vector.load %arg4[%c0_7, %c0_8] : memref<8x128xf32, #tpu.memory_space<vmem>>, vector<8x128xf32>
    tpu.vector_store %arg4[%c0_7, %c0_8], %26 {strides = array<i32>} : memref<8x128xf32, #tpu.memory_space<vmem>>, vector<8x128xf32>,
    %c0_9 = arith.constant 0 : index
    %c0_10 = arith.constant 0 : index
    %31 = vector.load %arg5[%c0_9, %c0_10] : memref<8x128xf32, #tpu.memory_space<vmem>>, vector<8x128xf32>
    tpu.vector_store %arg5[%c0_9, %c0_10], %29 {strides = array<i32>} : memref<8x128xf32, #tpu.memory_space<vmem>>, vector<8x128xf32>,
    return
  }
  func.func @transform_0(%arg0: i32, %arg1: i32) -> (i32, i32) {
    %c0_i32 = arith.constant 0 : i32
    return %arg0, %arg1 : i32, i32
  }
  func.func @transform_1(%arg0: i32, %arg1: i32) -> (i32, i32) {
    %c0_i32 = arith.constant 0 : i32
    return %arg0, %arg1 : i32, i32
  }
  func.func @transform_2(%arg0: i32, %arg1: i32) -> (i32, i32) {
    %c0_i32 = arith.constant 0 : i32
    return %arg0, %arg1 : i32, i32
  }
  func.func @transform_3(%arg0: i32, %arg1: i32) -> (i32, i32) {
    %c0_i32 = arith.constant 0 : i32
    return %arg0, %arg1 : i32, i32
  }
}

</mosaic_0001>

<bundles_post_ra>
// kernel: tpu_custom_call.1
= control target key start
LH: loop header
LB: loop body
LE: loop exit
PB: predicated region body
PF: predicated region fallthrough
CT: control target
= control target key end

     0   :  { %9 = vsyncpa [#allocation3], 0  ;;  %s259_s0 = inlined_call_operand.hbm [shape: f32[8,256], index: 0, kind: input, shape index: {}]   ;;  %s260_s1 = inlined_call_operand.hbm [shape: f32[8,256], index: 1, kind: input, shape index: {}]   ;;  %s261_s2 = inlined_call_operand.hbm [shape: f32[8,128], index: 2, kind: output, shape index: {0}]   ;;  %s262_s3 = inlined_call_operand.hbm [shape: f32[8,128], index: 3, kind: output, shape index: {1}]  }
   0x1   :  { %10 = vsyncpa [#allocation6], 0 }
   0x2   :  { %11 = vsyncpa [#allocation4], 0 }
   0x3   :  { %12 = vsyncpa [#allocation9], 0  ;;  %s218_s12 = smov [#allocation2]   ;;  %s219_s14 = smov [#allocation5]  }
   0x4   :  { %s19_s13 = sshll.u32 %s218_s12, 4  ;;  %s29_s15 = sshll.u32 %s219_s14, 4  ;;  %s20_s13 = int_to_ptr.vmem [resolvable:$true] %s19_s13  ;;  %s30_s15 = int_to_ptr.vmem [resolvable:$true] %s29_s15 }
   0x5   :  { %s138_s16 = scalar_lea.vmem %s20_s13, 256  ;;  %p143_p1 = scmp.lt.s32.totalorder %s20_s13, %s20_s13 }
   0x6   :  { %p139_p0 = scmp.ne.s32.totalorder %s20_s13, %s138_s16  ;;  %p144_p2 = scmp.lt.s32.totalorder %s138_s16, %s138_s16 }
   0x8   :  { %p145_p3 = por %p144_p2, %p143_p1 }
   0xa   :  { %p146_p4 = pnand %p145_p3, %p139_p0 }
   0xc   :  { %149 = shalt.err (!%p146_p4)
}
   0xd   :  { %22 = dma.hbm_to_vmem [thread:$0]  %s259_s0, 256, %s20_s13, [#allocation3]  }
   0xe   :  { %s158_s19 = scalar_lea.vmem %s30_s15, 256  ;;  %p163_p6 = scmp.lt.s32.totalorder %s30_s15, %s30_s15 }
   0xf   :  { %p159_p5 = scmp.ne.s32.totalorder %s30_s15, %s158_s19  ;;  %p164_p7 = scmp.lt.s32.totalorder %s158_s19, %s158_s19 }
  0x11   :  { %p165_p8 = por %p164_p7, %p163_p6 }
  0x13   :  { %p166_p9 = pnand %p165_p8, %p159_p5 }
  0x15   :  { %169 = shalt.err (!%p166_p9)
}
  0x16   :  { %32 = dma.hbm_to_vmem [thread:$0]  %s260_s1, 256, %s30_s15, [#allocation6]  }
  0x17   :  { %210 = dma.done.wait [#allocation3], 256  }
  0x18   :  { %211 = vsyncadd [#allocation3], 4294967040 }
  0x19   :  { %212 = dma.done.wait [#allocation6], 256  }
  0x1a   :  { %213 = vsyncadd [#allocation6], 4294967040  ;;  %v39_v0 = vld [vmem:[#allocation2] sm:$0xff]  ;;  %v40_v1 = vld [vmem:[#allocation2 + $0x8] sm:$0xff]  ;;  %s220_s0 = smov [#allocation8]   ;;  %v221_v6 = vmov 0.0  }
  0x1b   :  { %v41_v2 = vld [vmem:[#allocation5] sm:$0xff]  ;;  %v42_v3 = vld [vmem:[#allocation5 + $0x8] sm:$0xff]  ;;  %v43_v4 = vsub.f32 1.0, %v39_v0  ;;  %v44_v5 = vsub.f32 1.0, %v40_v1  ;;  %122 = vlog2.f32 %v39_v0  ;;  %s101_s22 = sshll.u32 %s220_s0, 4  ;;  %s102_s22 = int_to_ptr.vmem [resolvable:$true] %s101_s22 }
  0x1c   :  { %vm47_vm0 = vcmp.eq.f32.partialorder %v41_v2, 1.0  ;;  %vm48_vm1 = vcmp.eq.f32.partialorder %v42_v3, 1.0  ;;  %124 = vlog2.f32 %v40_v1  ;;  %s170_s1 = scalar_lea.vmem %s102_s22, 128  ;;  %p175_p11 = scmp.lt.s32.totalorder %s102_s22, %s102_s22 }
  0x1d   :  { %126 = vlog2.f32 %v43_v4  ;;  %v115_v7 = vsel %vm47_vm0, 1.0, %v221_v6  ;;  %v116_v8 = vsel %vm48_vm1, 1.0, %v221_v6  ;;  %p171_p10 = scmp.ne.s32.totalorder %s102_s22, %s170_s1  ;;  %p176_p12 = scmp.lt.s32.totalorder %s170_s1, %s170_s1 }
  0x1e   :  { %128 = vlog2.f32 %v44_v5  ;;  %v82_v9 = vadd.f32 %v116_v8, %v115_v7 }
  0x1f   :  { %p177_p13 = por %p176_p12, %p175_p11 }
  0x20   :  { %84 = vst [vmem:[#allocation8] sm:$0xff] %v82_v9 }
  0x21   :  { %p178_p0 = pnand %p177_p13, %p171_p10 }
  0x23   :  { %181 = shalt.err (!%p178_p0)
}
  0x24   :  { %104 = dma.vmem_to_hbm [thread:$0]  %s102_s22, 128, %s262_s3, [#allocation9]   ;;  %v45_v10 = vsub.f32 1.0, %v41_v2  ;;  %v46_v11 = vsub.f32 1.0, %v42_v3  ;;  %v63_v16 = vmul.f32 %v39_v0, %v39_v0  ;;  %v55_v19 = vmul.f32 %v43_v4, %v43_v4 }
  0x25   :  { %v64_v20 = vmul.f32 %v40_v1, %v40_v1  ;;  %v56_v23 = vmul.f32 %v44_v5, %v44_v5  ;;  %vm49_vm2 = vcmp.lt.f32.partialorder %v41_v2, 1.0  ;;  %vm50_vm3 = vcmp.lt.f32.partialorder %v42_v3, 1.0  ;;  %s222_s3 = smov [#allocation7]  }
  0x26   :  { %v67_v12 = vmul.f32 %v45_v10, %v45_v10  ;;  %v68_v14 = vmul.f32 %v46_v11, %v46_v11  ;;  %s91_s25 = sshll.u32 %s222_s3, 4  ;;  %s92_s25 = int_to_ptr.vmem [resolvable:$true] %s91_s25 }
  0x27   :  { %s190_s26 = scalar_lea.vmem %s92_s25, 128  ;;  %p195_p2 = scmp.lt.s32.totalorder %s92_s25, %s92_s25 }
  0x28   :  { %v123_v13 = vpop.eup %122  ;;  %v69_v25 = vmul.f32 %v67_v12, %v67_v12  ;;  %v70_v27 = vmul.f32 %v68_v14, %v68_v14  ;;  %p191_p1 = scmp.ne.s32.totalorder %s92_s25, %s190_s26  ;;  %p196_p3 = scmp.lt.s32.totalorder %s190_s26, %s190_s26 }
  0x29   :  { %v125_v15 = vpop.eup %124  ;;  %v52_v18 = vmul.f32 0.6931472, %v123_v13 }
  0x2a   :  { %v127_v17 = vpop.eup %126  ;;  %v54_v22 = vmul.f32 0.6931472, %v125_v15  ;;  %p197_p4 = por %p196_p3, %p195_p2 }
  0x2b   :  { %v129_v21 = vpop.eup %128  ;;  %v60_v24 = vmul.f32 0.6931472, %v127_v17  ;;  %v57_v29 = vmul.f32 %v55_v19, %v52_v18 }
  0x2c   :  { %v62_v26 = vmul.f32 0.6931472, %v129_v21  ;;  %v58_v31 = vmul.f32 %v56_v23, %v54_v22  ;;  %p198_p5 = pnand %p197_p4, %p191_p1 }
  0x2d   :  { %v65_v28 = vmul.f32 %v63_v16, %v60_v24 }
  0x2e   :  { %v66_v30 = vmul.f32 %v64_v20, %v62_v26 }
  0x2f   :  { %v71_v32 = vmul.f32 %v69_v25, %v65_v28 }
  0x30   :  { %v72_v33 = vmul.f32 %v70_v27, %v66_v30 }
  0x31   :  { %v73_v34 = vsel %vm49_vm2, %v71_v32, 0.0 }
  0x32   :  { %v74_v35 = vsel %vm50_vm3, %v72_v33, 0.0  ;;  %v75_v36 = vsel %vm47_vm0, %v57_v29, %v73_v34 }
  0x33   :  { %v76_v37 = vsel %vm48_vm1, %v58_v31, %v74_v35 }
  0x34   :  { %v81_v38 = vadd.f32 %v76_v37, %v75_v36 }
  0x36   :  { %83 = vst [vmem:[#allocation7] sm:$0xff] %v81_v38 }
  0x37   :  { %201 = shalt.err (!%p198_p5)
}
  0x38   :  { %94 = dma.vmem_to_hbm [thread:$0]  %s92_s25, 128, %s261_s2, [#allocation4]  }
  0x39   :  { %214 = dma.done.wait [#allocation4], 128  }
  0x3a   :  { %215 = vsyncadd [#allocation4], 4294967168 }
  0x3b   :  { %216 = dma.done.wait [#allocation9], 128  }
  0x3c   :  { %217 = vsyncadd [#allocation9], 4294967168 }
  0x3d   :  { %111 = vsyncpa [#allocation3], 1 }
  0x3e   :  { %112 = vsyncpa [#allocation6], 1 }
  0x3f   :  { %113 = vsyncpa [#allocation4], 1 }
  0x40   :  { %114 = vsyncpa [#allocation9], 1 }

</bundles_post_ra>
